<compile_context>
chip_gen: v7x
topology: tpu7x:2x2x1
jax: 0.10.0
libtpu: 0.0.40
codegen_flags: <defaults>
</compile_context>

<pallas_src>
import functools
import math

import jax
import jax.numpy as jnp
from jax.experimental import pallas as pl
from jax.experimental.pallas import tpu as pltpu


def _pick_tile(dim, target, align):
    """Largest multiple of `align` that divides `dim` and is <= target,
    falling back to the full dim (always a legal block)."""
    if dim <= target:
        return dim
    t = (target // align) * align
    while t >= align:
        if dim % t == 0:
            return t
        t -= align
    return dim


# ----------------------------------------------------------------------------
# Pallas kernel 1: tiled linear layer  y = x @ w + b   (w stored as (K, N))
# ----------------------------------------------------------------------------
def _linear_kernel(x_ref, w_ref, b_ref, o_ref, acc_ref):
    @pl.when(pl.program_id(2) == 0)
    def _init():
        acc_ref[...] = jnp.zeros_like(acc_ref)

    acc_ref[...] += jnp.dot(x_ref[...], w_ref[...],
                            preferred_element_type=jnp.float32)

    @pl.when(pl.program_id(2) == pl.num_programs(2) - 1)
    def _finalize():
        o_ref[...] = (acc_ref[...] + b_ref[...]).astype(o_ref.dtype)


def linear(x2d, w, b, *, tm=256, tn=256, tk=512):
    """x2d: (M, K), w: (K, N), b: (1, N) -> (M, N)."""
    M, K = x2d.shape
    N = w.shape[1]
    tm = _pick_tile(M, tm, 8)     # sublane dim of x / out
    tk = _pick_tile(K, tk, 128)   # lane dim of x, sublane dim of w
    tn = _pick_tile(N, tn, 128)   # lane dim of w / b / out
    grid = (M // tm, N // tn, K // tk)          # reduction axis last
    return pl.pallas_call(
        _linear_kernel,
        out_shape=jax.ShapeDtypeStruct((M, N), x2d.dtype),
        grid_spec=pltpu.PrefetchScalarGridSpec(
            num_scalar_prefetch=0,
            grid=grid,
            in_specs=[
                pl.BlockSpec((tm, tk), lambda i, j, kk: (i, kk)),
                pl.BlockSpec((tk, tn), lambda i, j, kk: (kk, j)),
                pl.BlockSpec((1, tn), lambda i, j, kk: (0, j)),
            ],
            out_specs=pl.BlockSpec((tm, tn), lambda i, j, kk: (i, j)),
            scratch_shapes=[pltpu.VMEM((tm, tn), jnp.float32)],
        ),
        compiler_params=pltpu.CompilerParams(
            dimension_semantics=("parallel", "parallel", "arbitrary")),
    )(x2d, w, b)


# ----------------------------------------------------------------------------
# Pallas kernel 2: all-heads attention for one batch, flash-style kv tiling,
# lane-dense (S, d_model) output (heads merged in-kernel).
# ----------------------------------------------------------------------------
def _attention_kernel(q_ref, k_ref, v_ref, bias_ref, o_ref,
                      m_ref, l_ref, acc_ref, *, num_heads, scale):
    ki = pl.program_id(2)

    @pl.when(ki == 0)
    def _init():
        m_ref[...] = jnp.full(m_ref.shape, -jnp.inf, jnp.float32)
        l_ref[...] = jnp.zeros(l_ref.shape, jnp.float32)
        acc_ref[...] = jnp.zeros(acc_ref.shape, jnp.float32)

    q = q_ref[0].astype(jnp.float32) * scale   # (H, tq, Dk); 1/sqrt(d_k) folded
    k = k_ref[0]                               # (H, tkv, Dk)
    v = v_ref[0]                               # (H, tkv, Dk)
    bias = bias_ref[0]                         # (tq, tkv), already mask * -1e9

    # Batched q @ k^T contracting the last dims: feeds the MXU directly,
    # no explicit transpose (XLU slot stays free).
    s = jnp.einsum("hqd,hkd->hqk", q, k, preferred_element_type=jnp.float32)
    s = s + bias[None, :, :]

    # Online (flash-style) softmax across kv tiles.
    m_prev = m_ref[...]
    m_new = jnp.maximum(m_prev, jnp.max(s, axis=-1, keepdims=True))
    alpha = jnp.exp(m_prev - m_new)
    p = jnp.exp(s - m_new)
    l_ref[...] = alpha * l_ref[...] + jnp.sum(p, axis=-1, keepdims=True)
    acc_ref[...] = alpha * acc_ref[...] + jnp.einsum(
        "hqk,hkd->hqd", p, v, preferred_element_type=jnp.float32)
    m_ref[...] = m_new

    @pl.when(ki == pl.num_programs(2) - 1)
    def _finalize():
        # EUP reciprocal instead of an elementwise divide.
        out = acc_ref[...] * pl.reciprocal(l_ref[...], approx=True)  # (H,tq,Dk)
        # Merge heads -> lane-dense (tq, H*Dk) = (tq, d_model), single store.
        merged = jnp.concatenate([out[h] for h in range(num_heads)], axis=-1)
        o_ref[0] = merged.astype(o_ref.dtype)


def attention(q, k, v, add_mask):
    """q,k,v: (B, H, S, Dk); add_mask: (B, S, S) additive -> (B, S, H*Dk)."""
    B, H, S, Dk = q.shape
    d_model = H * Dk
    tq = _pick_tile(S, 256, 8)
    tkv = _pick_tile(S, 256, 128)   # lane dim of the mask block -> 128-aligned
    grid = (B, S // tq, S // tkv)
    kernel = functools.partial(_attention_kernel, num_heads=H,
                               scale=1.0 / math.sqrt(Dk))
    return pl.pallas_call(
        kernel,
        out_shape=jax.ShapeDtypeStruct((B, S, d_model), q.dtype),
        grid_spec=pltpu.PrefetchScalarGridSpec(
            num_scalar_prefetch=0,
            grid=grid,
            in_specs=[
                pl.BlockSpec((1, H, tq, Dk), lambda b, qi, ki: (b, 0, qi, 0)),
                pl.BlockSpec((1, H, tkv, Dk), lambda b, qi, ki: (b, 0, ki, 0)),
                pl.BlockSpec((1, H, tkv, Dk), lambda b, qi, ki: (b, 0, ki, 0)),
                pl.BlockSpec((1, tq, tkv), lambda b, qi, ki: (b, qi, ki)),
            ],
            out_specs=pl.BlockSpec((1, tq, d_model),
                                   lambda b, qi, ki: (b, qi, 0)),
            scratch_shapes=[
                pltpu.VMEM((H, tq, 1), jnp.float32),    # running max  m
                pltpu.VMEM((H, tq, 1), jnp.float32),    # running sum  l
                pltpu.VMEM((H, tq, Dk), jnp.float32),   # running acc
            ],
        ),
        compiler_params=pltpu.CompilerParams(
            dimension_semantics=("parallel", "parallel", "arbitrary")),
    )(q, k, v, add_mask)


# ----------------------------------------------------------------------------
# Parameter prep (one-time): fuse Q/K/V projection weights into one matmul.
# ----------------------------------------------------------------------------
def fuse_params(params):
    return {
        "wqkv_w": jnp.concatenate(
            [params["wq_w"], params["wk_w"], params["wv_w"]], axis=1),
        "wqkv_b": jnp.concatenate(
            [params["wq_b"], params["wk_b"], params["wv_b"]], axis=1),
        "dense_w": params["dense_w"],
        "dense_b": params["dense_b"],
    }


# ----------------------------------------------------------------------------
# MultiHeadAttention forward (glue in plain JAX, hot paths in Pallas kernels)
# ----------------------------------------------------------------------------
def mha_forward(x, mask, fused, num_heads):
    B, S, input_dim = x.shape
    d_model = fused["dense_w"].shape[1]
    d_k = d_model // num_heads

    # Fused Q/K/V projection: x read once, one wide (K, 3*d_model) matmul.
    x2d = x.reshape(B * S, input_dim)
    qkv = linear(x2d, fused["wqkv_w"], fused["wqkv_b"])     # (B*S, 3*d_model)

    # Module's raw .view(B, H, S, d_k) head split (no transpose).
    q = qkv[:, :d_model].reshape(B, num_heads, S, d_k)
    k = qkv[:, d_model:2 * d_model].reshape(B, num_heads, S, d_k)
    v = qkv[:, 2 * d_model:].reshape(B, num_heads, S, d_k)

    # Additive mask precomputed once (not re-multiplied per (batch, head)).
    add_mask = (mask * (-1000000000.0)).astype(jnp.float32)

    ctx = attention(q, k, v, add_mask)      # (B, S, d_model), lane-dense
    out = linear(ctx.reshape(B * S, d_model),
                 fused["dense_w"], fused["dense_b"])
    return out.reshape(B, S, d_model)


# Pure-JAX reference replicating the PyTorch forward exactly.
def mha_reference(x, mask, params, num_heads):
    B, S, _ = x.shape
    d_model = params["wq_w"].shape[1]
    d_k = d_model // num_heads

    def lin(x2, w, b):
        return x2 @ w + b

    x2d = x.reshape(B * S, -1)
    q = lin(x2d, params["wq_w"], params["wq_b"]).reshape(B, num_heads, S, d_k)
    k = lin(x2d, params["wk_w"], params["wk_b"]).reshape(B, num_heads, S, d_k)
    v = lin(x2d, params["wv_w"], params["wv_b"]).reshape(B, num_heads, S, d_k)

    score = jnp.einsum("bhqd,bhkd->bhqk", q, k) / math.sqrt(d_k)
    score = score + mask[:, None, :, :] * (-1000000000.0)
    p = jax.nn.softmax(score, axis=-1)
    res = jnp.einsum("bhqk,bhkd->bhqd", p, v)
    res = res.transpose(0, 2, 1, 3).reshape(B * S, d_model)
    res = lin(res, params["dense_w"], params["dense_b"])
    return res.reshape(B, S, d_model)


def init_params(key, input_dim, d_model):
    ks = jax.random.split(key, 8)
    scale_in = 1.0 / math.sqrt(input_dim)
    scale_dm = 1.0 / math.sqrt(d_model)
    # Weights stored pre-transposed as (in_features, out_features).
    return {
        "wq_w": jax.random.uniform(ks[0], (input_dim, d_model), jnp.float32,
                                   -scale_in, scale_in),
        "wq_b": jax.random.uniform(ks[1], (1, d_model), jnp.float32,
                                   -scale_in, scale_in),
        "wk_w": jax.random.uniform(ks[2], (input_dim, d_model), jnp.float32,
                                   -scale_in, scale_in),
        "wk_b": jax.random.uniform(ks[3], (1, d_model), jnp.float32,
                                   -scale_in, scale_in),
        "wv_w": jax.random.uniform(ks[4], (input_dim, d_model), jnp.float32,
                                   -scale_in, scale_in),
        "wv_b": jax.random.uniform(ks[5], (1, d_model), jnp.float32,
                                   -scale_in, scale_in),
        "dense_w": jax.random.uniform(ks[6], (d_model, d_model), jnp.float32,
                                      -scale_dm, scale_dm),
        "dense_b": jax.random.uniform(ks[7], (1, d_model), jnp.float32,
                                      -scale_dm, scale_dm),
    }


if __name__ == "__main__":
    B, S, input_dim, d_model, num_heads = 2, 8, 16, 32, 4

    key = jax.random.PRNGKey(0)
    k_x, k_m, k_p = jax.random.split(key, 3)

    x = jax.random.normal(k_x, (B, S, input_dim), jnp.float32)
    # Binary mask (1 = masked), e.g. padding mask broadcast over queries.
    mask = (jax.random.uniform(k_m, (B, S, S)) > 0.8).astype(jnp.float32)
    params = init_params(k_p, input_dim, d_model)
    fused = fuse_params(params)   # one-time weight fusion (Q/K/V -> one matmul)

    fwd = jax.jit(functools.partial(mha_forward, num_heads=num_heads))
    out = fwd(x, mask, fused)
    out = jax.block_until_ready(out)

    ref = mha_reference(x, mask, params, num_heads)
    assert out.shape == (B, S, d_model)
    # Approx (EUP) reciprocal in the softmax normalization adds ~1e-3-level
    # relative error vs. the exact-divide reference; everything else is f32.
    assert jnp.allclose(out, ref, atol=5e-3, rtol=5e-3), "mismatch vs reference"

    print("KERNEL_OK")
</pallas_src>

<mosaic_0001>
module attributes {stable_mosaic.version = 11 : i64} {
  func.func @_linear_kernel(%arg0: i32, %arg1: i32, %arg2: i32, %arg3: memref<16x16xf32, #tpu.memory_space<vmem>>, %arg4: memref<16x96xf32, #tpu.memory_space<vmem>>, %arg5: memref<1x96xf32, #tpu.memory_space<vmem>>, %arg6: memref<16x96xf32, #tpu.memory_space<vmem>>, %arg7: memref<16x96xf32, #tpu.memory_space<vmem>>) attributes {dimension_semantics = [#tpu.dimension_semantics<parallel>, #tpu.dimension_semantics<parallel>, #tpu.dimension_semantics<arbitrary>], iteration_bounds = array<i64: 1, 1, 1>, scalar_prefetch = 0 : i64, scratch_operands = 1 : i64, tpu.core_type = #tpu.core_type<tc>, window_params = [{transform_indices = @transform_0, window_bounds = array<i64: 16, 16>}, {transform_indices = @transform_1, window_bounds = array<i64: 16, 96>}, {transform_indices = @transform_2, window_bounds = array<i64: 1, 96>}, {transform_indices = @transform_3, window_bounds = array<i64: 16, 96>}]} {
    %c0_i32 = arith.constant 0 : i32
    %0 = arith.cmpi eq, %arg2, %c0_i32 : i32
    %1 = arith.extui %0 : i1 to i32
    %c0_i32_0 = arith.constant 0 : i32
    %2 = arith.cmpi ne, %1, %c0_i32_0 : i32
    scf.if %2 {
      %cst_10 = arith.constant 0.000000e+00 : f32
      %12 = vector.broadcast %cst_10 : f32 to vector<16x96xf32>
      %c0_11 = arith.constant 0 : index
      %c0_12 = arith.constant 0 : index
      %13 = vector.load %arg7[%c0_11, %c0_12] : memref<16x96xf32, #tpu.memory_space<vmem>>, vector<16x96xf32>
      tpu.vector_store %arg7[%c0_11, %c0_12], %12 {strides = array<i32>} : memref<16x96xf32, #tpu.memory_space<vmem>>, vector<16x96xf32>,
    } else {
    }
    %c0 = arith.constant 0 : index
    %c0_1 = arith.constant 0 : index
    %3 = vector.load %arg7[%c0, %c0_1] : memref<16x96xf32, #tpu.memory_space<vmem>>, vector<16x96xf32>
    %c0_2 = arith.constant 0 : index
    %c0_3 = arith.constant 0 : index
    %4 = vector.load %arg3[%c0_2, %c0_3] : memref<16x16xf32, #tpu.memory_space<vmem>>, vector<16x16xf32>
    %c0_4 = arith.constant 0 : index
    %c0_5 = arith.constant 0 : index
    %5 = vector.load %arg4[%c0_4, %c0_5] : memref<16x96xf32, #tpu.memory_space<vmem>>, vector<16x96xf32>
    %cst = arith.constant dense<0.000000e+00> : vector<16x96xf32>
    %6 = tpu.matmul %4, %5, %cst {dimension_numbers = #tpu.dot_dimension_numbers<[1], [0], [0], [1], [0, 0, 1, 1], [], []>} : vector<16x16xf32>, vector<16x96xf32>, vector<16x96xf32> -> vector<16x96xf32>
    %7 = arith.addf %3, %6 : vector<16x96xf32>
    %c0_6 = arith.constant 0 : index
    %c0_7 = arith.constant 0 : index
    %8 = vector.load %arg7[%c0_6, %c0_7] : memref<16x96xf32, #tpu.memory_space<vmem>>, vector<16x96xf32>
    tpu.vector_store %arg7[%c0_6, %c0_7], %7 {strides = array<i32>} : memref<16x96xf32, #tpu.memory_space<vmem>>, vector<16x96xf32>,
    %c0_i32_8 = arith.constant 0 : i32
    %9 = arith.cmpi eq, %arg2, %c0_i32_8 : i32
    %10 = arith.extui %9 : i1 to i32
    %c0_i32_9 = arith.constant 0 : i32
    %11 = arith.cmpi ne, %10, %c0_i32_9 : i32
    scf.if %11 {
      %c0_10 = arith.constant 0 : index
      %c0_11 = arith.constant 0 : index
      %12 = vector.load %arg7[%c0_10, %c0_11] : memref<16x96xf32, #tpu.memory_space<vmem>>, vector<16x96xf32>
      %c0_12 = arith.constant 0 : index
      %c0_13 = arith.constant 0 : index
      %13 = vector.load %arg5[%c0_12, %c0_13] : memref<1x96xf32, #tpu.memory_space<vmem>>, vector<1x96xf32>
      %14 = vector.broadcast %13 : vector<1x96xf32> to vector<16x96xf32>
      %15 = arith.addf %12, %14 : vector<16x96xf32>
      %c0_14 = arith.constant 0 : index
      %c0_15 = arith.constant 0 : index
      %16 = vector.load %arg6[%c0_14, %c0_15] : memref<16x96xf32, #tpu.memory_space<vmem>>, vector<16x96xf32>
      tpu.vector_store %arg6[%c0_14, %c0_15], %15 {strides = array<i32>} : memref<16x96xf32, #tpu.memory_space<vmem>>, vector<16x96xf32>,
    } else {
    }
    return
  }
  func.func @transform_0(%arg0: i32, %arg1: i32, %arg2: i32) -> (i32, i32) {
    %c0_i32 = arith.constant 0 : i32
    return %arg0, %arg2 : i32, i32
  }
  func.func @transform_1(%arg0: i32, %arg1: i32, %arg2: i32) -> (i32, i32) {
    %c0_i32 = arith.constant 0 : i32
    return %arg2, %arg1 : i32, i32
  }
  func.func @transform_2(%arg0: i32, %arg1: i32, %arg2: i32) -> (i32, i32) {
    %c0_i32 = arith.constant 0 : i32
    %c0_i32_0 = arith.constant 0 : i32
    return %c0_i32, %arg1 : i32, i32
  }
  func.func @transform_3(%arg0: i32, %arg1: i32, %arg2: i32) -> (i32, i32) {
    %c0_i32 = arith.constant 0 : i32
    return %arg0, %arg1 : i32, i32
  }
}

module attributes {stable_mosaic.version = 11 : i64} {
  func.func @_attention_kernel(%arg0: i32, %arg1: i32, %arg2: i32, %arg3: memref<1x4x8x8xf32, #tpu.memory_space<vmem>>, %arg4: memref<1x4x8x8xf32, #tpu.memory_space<vmem>>, %arg5: memref<1x4x8x8xf32, #tpu.memory_space<vmem>>, %arg6: memref<1x8x8xf32, #tpu.memory_space<vmem>>, %arg7: memref<1x8x32xf32, #tpu.memory_space<vmem>>, %arg8: memref<4x8x1xf32, #tpu.memory_space<vmem>>, %arg9: memref<4x8x1xf32, #tpu.memory_space<vmem>>, %arg10: memref<4x8x8xf32, #tpu.memory_space<vmem>>) attributes {dimension_semantics = [#tpu.dimension_semantics<parallel>, #tpu.dimension_semantics<parallel>, #tpu.dimension_semantics<arbitrary>], iteration_bounds = array<i64: 2, 1, 1>, scalar_prefetch = 0 : i64, scratch_operands = 3 : i64, tpu.core_type = #tpu.core_type<tc>, window_params = [{transform_indices = @transform_0, window_bounds = array<i64: 1, 4, 8, 8>}, {transform_indices = @transform_1, window_bounds = array<i64: 1, 4, 8, 8>}, {transform_indices = @transform_2, window_bounds = array<i64: 1, 4, 8, 8>}, {transform_indices = @transform_3, window_bounds = array<i64: 1, 8, 8>}, {transform_indices = @transform_4, window_bounds = array<i64: 1, 8, 32>}]} {
    %c0_i32 = arith.constant 0 : i32
    %0 = arith.cmpi eq, %arg2, %c0_i32 : i32
    %1 = arith.extui %0 : i1 to i32
    %c0_i32_0 = arith.constant 0 : i32
    %2 = arith.cmpi ne, %1, %c0_i32_0 : i32
    scf.if %2 {
      %cst_39 = arith.constant 0xFF800000 : f32
      %42 = vector.broadcast %cst_39 : f32 to vector<4x8x1xf32>
      %c0_40 = arith.constant 0 : index
      %c0_41 = arith.constant 0 : index
      %c0_42 = arith.constant 0 : index
      %43 = vector.load %arg8[%c0_40, %c0_41, %c0_42] : memref<4x8x1xf32, #tpu.memory_space<vmem>>, vector<4x8x1xf32>
      tpu.vector_store %arg8[%c0_40, %c0_41, %c0_42], %42 {strides = array<i32>} : memref<4x8x1xf32, #tpu.memory_space<vmem>>, vector<4x8x1xf32>,
      %cst_43 = arith.constant 0.000000e+00 : f32
      %44 = vector.broadcast %cst_43 : f32 to vector<4x8x1xf32>
      %c0_44 = arith.constant 0 : index
      %c0_45 = arith.constant 0 : index
      %c0_46 = arith.constant 0 : index
      %45 = vector.load %arg9[%c0_44, %c0_45, %c0_46] : memref<4x8x1xf32, #tpu.memory_space<vmem>>, vector<4x8x1xf32>
      tpu.vector_store %arg9[%c0_44, %c0_45, %c0_46], %44 {strides = array<i32>} : memref<4x8x1xf32, #tpu.memory_space<vmem>>, vector<4x8x1xf32>,
      %cst_47 = arith.constant 0.000000e+00 : f32
      %46 = vector.broadcast %cst_47 : f32 to vector<4x8x8xf32>
      %c0_48 = arith.constant 0 : index
      %c0_49 = arith.constant 0 : index
      %c0_50 = arith.constant 0 : index
      %47 = vector.load %arg10[%c0_48, %c0_49, %c0_50] : memref<4x8x8xf32, #tpu.memory_space<vmem>>, vector<4x8x8xf32>
      tpu.vector_store %arg10[%c0_48, %c0_49, %c0_50], %46 {strides = array<i32>} : memref<4x8x8xf32, #tpu.memory_space<vmem>>, vector<4x8x8xf32>,
    } else {
    }
    %c0 = arith.constant 0 : index
    %c0_1 = arith.constant 0 : index
    %c0_2 = arith.constant 0 : index
    %c0_3 = arith.constant 0 : index
    %3 = vector.load %arg3[%c0, %c0_1, %c0_2, %c0_3] : memref<1x4x8x8xf32, #tpu.memory_space<vmem>>, vector<1x4x8x8xf32>
    %4 = vector.shape_cast %3 : vector<1x4x8x8xf32> to vector<4x8x8xf32>
    %cst = arith.constant 0.353553385 : f32
    %5 = vector.broadcast %cst : f32 to vector<4x8x8xf32>
    %6 = arith.mulf %4, %5 : vector<4x8x8xf32>
    %c0_4 = arith.constant 0 : index
    %c0_5 = arith.constant 0 : index
    %c0_6 = arith.constant 0 : index
    %c0_7 = arith.constant 0 : index
    %7 = vector.load %arg4[%c0_4, %c0_5, %c0_6, %c0_7] : memref<1x4x8x8xf32, #tpu.memory_space<vmem>>, vector<1x4x8x8xf32>
    %8 = vector.shape_cast %7 : vector<1x4x8x8xf32> to vector<4x8x8xf32>
    %c0_8 = arith.constant 0 : index
    %c0_9 = arith.constant 0 : index
    %c0_10 = arith.constant 0 : index
    %c0_11 = arith.constant 0 : index
    %9 = vector.load %arg5[%c0_8, %c0_9, %c0_10, %c0_11] : memref<1x4x8x8xf32, #tpu.memory_space<vmem>>, vector<1x4x8x8xf32>
    %10 = vector.shape_cast %9 : vector<1x4x8x8xf32> to vector<4x8x8xf32>
    %c0_12 = arith.constant 0 : index
    %c0_13 = arith.constant 0 : index
    %c0_14 = arith.constant 0 : index
    %11 = vector.load %arg6[%c0_12, %c0_13, %c0_14] : memref<1x8x8xf32, #tpu.memory_space<vmem>>, vector<1x8x8xf32>
    %12 = vector.shape_cast %11 : vector<1x8x8xf32> to vector<8x8xf32>
    "tpu.trace_start"() <{level = 10 : i32, message = "hqd,hkd->hqk"}> : () -> ()
    %cst_15 = arith.constant dense<0.000000e+00> : vector<4x8x8xf32>
    %13 = tpu.matmul %6, %8, %cst_15 {dimension_numbers = #tpu.dot_dimension_numbers<[2], [2], [1], [1], [0, 0, 0, 1, 1, 1], [0], [0]>} : vector<4x8x8xf32>, vector<4x8x8xf32>, vector<4x8x8xf32> -> vector<4x8x8xf32>
    "tpu.trace_stop"() : () -> ()
    %14 = vector.shape_cast %12 : vector<8x8xf32> to vector<1x8x8xf32>
    %15 = vector.broadcast %14 : vector<1x8x8xf32> to vector<4x8x8xf32>
    %16 = arith.addf %13, %15 : vector<4x8x8xf32>
    %c0_16 = arith.constant 0 : index
    %c0_17 = arith.constant 0 : index
    %c0_18 = arith.constant 0 : index
    %17 = vector.load %arg8[%c0_16, %c0_17, %c0_18] : memref<4x8x1xf32, #tpu.memory_space<vmem>>, vector<4x8x1xf32>
    %cst_19 = arith.constant dense<0xFF800000> : vector<4x8xf32>
    %18 = vector.multi_reduction <maximumf>, %16, %cst_19 [2] : vector<4x8x8xf32> to vector<4x8xf32>
    %19 = vector.shape_cast %18 : vector<4x8xf32> to vector<4x8x1xf32>
    %20 = arith.maximumf %17, %19 : vector<4x8x1xf32>
    %21 = arith.subf %17, %20 : vector<4x8x1xf32>
    %22 = math.exp %21 : vector<4x8x1xf32>
    %23 = vector.broadcast %20 : vector<4x8x1xf32> to vector<4x8x8xf32>
    %24 = arith.subf %16, %23 : vector<4x8x8xf32>
    %25 = math.exp %24 : vector<4x8x8xf32>
    %c0_20 = arith.constant 0 : index
    %c0_21 = arith.constant 0 : index
    %c0_22 = arith.constant 0 : index
    %26 = vector.load %arg9[%c0_20, %c0_21, %c0_22] : memref<4x8x1xf32, #tpu.memory_space<vmem>>, vector<4x8x1xf32>
    %27 = arith.mulf %22, %26 : vector<4x8x1xf32>
    %cst_23 = arith.constant dense<0.000000e+00> : vector<4x8xf32>
    %28 = vector.multi_reduction <add>, %25, %cst_23 [2] : vector<4x8x8xf32> to vector<4x8xf32>
    %29 = vector.shape_cast %28 : vector<4x8xf32> to vector<4x8x1xf32>
    %30 = arith.addf %27, %29 : vector<4x8x1xf32>
    %c0_24 = arith.constant 0 : index
    %c0_25 = arith.constant 0 : index
    %c0_26 = arith.constant 0 : index
    %31 = vector.load %arg9[%c0_24, %c0_25, %c0_26] : memref<4x8x1xf32, #tpu.memory_space<vmem>>, vector<4x8x1xf32>
    tpu.vector_store %arg9[%c0_24, %c0_25, %c0_26], %30 {strides = array<i32>} : memref<4x8x1xf32, #tpu.memory_space<vmem>>, vector<4x8x1xf32>,
    %c0_27 = arith.constant 0 : index
    %c0_28 = arith.constant 0 : index
    %c0_29 = arith.constant 0 : index
    %32 = vector.load %arg10[%c0_27, %c0_28, %c0_29] : memref<4x8x8xf32, #tpu.memory_space<vmem>>, vector<4x8x8xf32>
    %33 = vector.broadcast %22 : vector<4x8x1xf32> to vector<4x8x8xf32>
    %34 = arith.mulf %33, %32 : vector<4x8x8xf32>
    "tpu.trace_start"() <{level = 10 : i32, message = "hqk,hkd->hqd"}> : () -> ()
    %cst_30 = arith.constant dense<0.000000e+00> : vector<4x8x8xf32>
    %35 = tpu.matmul %25, %10, %cst_30 {dimension_numbers = #tpu.dot_dimension_numbers<[2], [1], [1], [2], [0, 0, 0, 1, 1, 2], [0], [0]>} : vector<4x8x8xf32>, vector<4x8x8xf32>, vector<4x8x8xf32> -> vector<4x8x8xf32>
    "tpu.trace_stop"() : () -> ()
    %36 = arith.addf %34, %35 : vector<4x8x8xf32>
    %c0_31 = arith.constant 0 : index
    %c0_32 = arith.constant 0 : index
    %c0_33 = arith.constant 0 : index
    %37 = vector.load %arg10[%c0_31, %c0_32, %c0_33] : memref<4x8x8xf32, #tpu.memory_space<vmem>>, vector<4x8x8xf32>
    tpu.vector_store %arg10[%c0_31, %c0_32, %c0_33], %36 {strides = array<i32>} : memref<4x8x8xf32, #tpu.memory_space<vmem>>, vector<4x8x8xf32>,
    %c0_34 = arith.constant 0 : index
    %c0_35 = arith.constant 0 : index
    %c0_36 = arith.constant 0 : index
    %38 = vector.load %arg8[%c0_34, %c0_35, %c0_36] : memref<4x8x1xf32, #tpu.memory_space<vmem>>, vector<4x8x1xf32>
    tpu.vector_store %arg8[%c0_34, %c0_35, %c0_36], %20 {strides = array<i32>} : memref<4x8x1xf32, #tpu.memory_space<vmem>>, vector<4x8x1xf32>,
    %c0_i32_37 = arith.constant 0 : i32
    %39 = arith.cmpi eq, %arg2, %c0_i32_37 : i32
    %40 = arith.extui %39 : i1 to i32
    %c0_i32_38 = arith.constant 0 : i32
    %41 = arith.cmpi ne, %40, %c0_i32_38 : i32
    scf.if %41 {
      %c0_39 = arith.constant 0 : index
      %c0_40 = arith.constant 0 : index
      %c0_41 = arith.constant 0 : index
      %42 = vector.load %arg10[%c0_39, %c0_40, %c0_41] : memref<4x8x8xf32, #tpu.memory_space<vmem>>, vector<4x8x8xf32>
      %c0_42 = arith.constant 0 : index
      %c0_43 = arith.constant 0 : index
      %c0_44 = arith.constant 0 : index
      %43 = vector.load %arg9[%c0_42, %c0_43, %c0_44] : memref<4x8x1xf32, #tpu.memory_space<vmem>>, vector<4x8x1xf32>
      %44 = tpu.reciprocal %43 {approx = true} : vector<4x8x1xf32> -> vector<4x8x1xf32>
      %45 = vector.broadcast %44 : vector<4x8x1xf32> to vector<4x8x8xf32>
      %46 = arith.mulf %42, %45 : vector<4x8x8xf32>
      %47 = vector.extract_strided_slice %46 {offsets = [0, 0, 0], sizes = [1, 8, 8], strides = [1, 1, 1]} : vector<4x8x8xf32> to vector<1x8x8xf32>
      %48 = vector.shape_cast %47 : vector<1x8x8xf32> to vector<8x8xf32>
      %49 = vector.extract_strided_slice %46 {offsets = [1, 0, 0], sizes = [1, 8, 8], strides = [1, 1, 1]} : vector<4x8x8xf32> to vector<1x8x8xf32>
      %50 = vector.shape_cast %49 : vector<1x8x8xf32> to vector<8x8xf32>
      %51 = vector.extract_strided_slice %46 {offsets = [2, 0, 0], sizes = [1, 8, 8], strides = [1, 1, 1]} : vector<4x8x8xf32> to vector<1x8x8xf32>
      %52 = vector.shape_cast %51 : vector<1x8x8xf32> to vector<8x8xf32>
      %53 = vector.extract_strided_slice %46 {offsets = [3, 0, 0], sizes = [1, 8, 8], strides = [1, 1, 1]} : vector<4x8x8xf32> to vector<1x8x8xf32>
      %54 = vector.shape_cast %53 : vector<1x8x8xf32> to vector<8x8xf32>
      %55 = tpu.concatenate %48, %50, %52, %54 in 1 : vector<8x8xf32>, vector<8x8xf32>, vector<8x8xf32>, vector<8x8xf32> -> vector<8x32xf32>
      %c0_45 = arith.constant 0 : index
      %c0_46 = arith.constant 0 : index
      %c0_47 = arith.constant 0 : index
      %56 = vector.load %arg7[%c0_45, %c0_46, %c0_47] : memref<1x8x32xf32, #tpu.memory_space<vmem>>, vector<1x8x32xf32>
      %57 = vector.shape_cast %56 : vector<1x8x32xf32> to vector<8x32xf32>
      %58 = vector.shape_cast %55 : vector<8x32xf32> to vector<1x8x32xf32>
      tpu.vector_store %arg7[%c0_45, %c0_46, %c0_47], %58 {strides = array<i32>} : memref<1x8x32xf32, #tpu.memory_space<vmem>>, vector<1x8x32xf32>,
    } else {
    }
    return
  }
  func.func @transform_0(%arg0: i32, %arg1: i32, %arg2: i32) -> (i32, i32, i32, i32) {
    %c0_i32 = arith.constant 0 : i32
    %c0_i32_0 = arith.constant 0 : i32
    %c0_i32_1 = arith.constant 0 : i32
    return %arg0, %c0_i32, %arg1, %c0_i32_0 : i32, i32, i32, i32
  }
  func.func @transform_1(%arg0: i32, %arg1: i32, %arg2: i32) -> (i32, i32, i32, i32) {
    %c0_i32 = arith.constant 0 : i32
    %c0_i32_0 = arith.constant 0 : i32
    %c0_i32_1 = arith.constant 0 : i32
    return %arg0, %c0_i32, %arg2, %c0_i32_0 : i32, i32, i32, i32
  }
  func.func @transform_2(%arg0: i32, %arg1: i32, %arg2: i32) -> (i32, i32, i32, i32) {
    %c0_i32 = arith.constant 0 : i32
    %c0_i32_0 = arith.constant 0 : i32
    %c0_i32_1 = arith.constant 0 : i32
    return %arg0, %c0_i32, %arg2, %c0_i32_0 : i32, i32, i32, i32
  }
  func.func @transform_3(%arg0: i32, %arg1: i32, %arg2: i32) -> (i32, i32, i32) {
    %c0_i32 = arith.constant 0 : i32
    return %arg0, %arg1, %arg2 : i32, i32, i32
  }
  func.func @transform_4(%arg0: i32, %arg1: i32, %arg2: i32) -> (i32, i32, i32) {
    %c0_i32 = arith.constant 0 : i32
    %c0_i32_0 = arith.constant 0 : i32
    return %arg0, %arg1, %c0_i32 : i32, i32, i32
  }
}

module attributes {stable_mosaic.version = 11 : i64} {
  func.func @_linear_kernel(%arg0: i32, %arg1: i32, %arg2: i32, %arg3: memref<16x32xf32, #tpu.memory_space<vmem>>, %arg4: memref<32x32xf32, #tpu.memory_space<vmem>>, %arg5: memref<1x32xf32, #tpu.memory_space<vmem>>, %arg6: memref<16x32xf32, #tpu.memory_space<vmem>>, %arg7: memref<16x32xf32, #tpu.memory_space<vmem>>) attributes {dimension_semantics = [#tpu.dimension_semantics<parallel>, #tpu.dimension_semantics<parallel>, #tpu.dimension_semantics<arbitrary>], iteration_bounds = array<i64: 1, 1, 1>, scalar_prefetch = 0 : i64, scratch_operands = 1 : i64, tpu.core_type = #tpu.core_type<tc>, window_params = [{transform_indices = @transform_0, window_bounds = array<i64: 16, 32>}, {transform_indices = @transform_1, window_bounds = array<i64: 32, 32>}, {transform_indices = @transform_2, window_bounds = array<i64: 1, 32>}, {transform_indices = @transform_3, window_bounds = array<i64: 16, 32>}]} {
    %c0_i32 = arith.constant 0 : i32
    %0 = arith.cmpi eq, %arg2, %c0_i32 : i32
    %1 = arith.extui %0 : i1 to i32
    %c0_i32_0 = arith.constant 0 : i32
    %2 = arith.cmpi ne, %1, %c0_i32_0 : i32
    scf.if %2 {
      %cst_10 = arith.constant 0.000000e+00 : f32
      %12 = vector.broadcast %cst_10 : f32 to vector<16x32xf32>
      %c0_11 = arith.constant 0 : index
      %c0_12 = arith.constant 0 : index
      %13 = vector.load %arg7[%c0_11, %c0_12] : memref<16x32xf32, #tpu.memory_space<vmem>>, vector<16x32xf32>
      tpu.vector_store %arg7[%c0_11, %c0_12], %12 {strides = array<i32>} : memref<16x32xf32, #tpu.memory_space<vmem>>, vector<16x32xf32>,
    } else {
    }
    %c0 = arith.constant 0 : index
    %c0_1 = arith.constant 0 : index
    %3 = vector.load %arg7[%c0, %c0_1] : memref<16x32xf32, #tpu.memory_space<vmem>>, vector<16x32xf32>
    %c0_2 = arith.constant 0 : index
    %c0_3 = arith.constant 0 : index
    %4 = vector.load %arg3[%c0_2, %c0_3] : memref<16x32xf32, #tpu.memory_space<vmem>>, vector<16x32xf32>
    %c0_4 = arith.constant 0 : index
    %c0_5 = arith.constant 0 : index
    %5 = vector.load %arg4[%c0_4, %c0_5] : memref<32x32xf32, #tpu.memory_space<vmem>>, vector<32x32xf32>
    %cst = arith.constant dense<0.000000e+00> : vector<16x32xf32>
    %6 = tpu.matmul %4, %5, %cst {dimension_numbers = #tpu.dot_dimension_numbers<[1], [0], [0], [1], [0, 0, 1, 1], [], []>} : vector<16x32xf32>, vector<32x32xf32>, vector<16x32xf32> -> vector<16x32xf32>
    %7 = arith.addf %3, %6 : vector<16x32xf32>
    %c0_6 = arith.constant 0 : index
    %c0_7 = arith.constant 0 : index
    %8 = vector.load %arg7[%c0_6, %c0_7] : memref<16x32xf32, #tpu.memory_space<vmem>>, vector<16x32xf32>
    tpu.vector_store %arg7[%c0_6, %c0_7], %7 {strides = array<i32>} : memref<16x32xf32, #tpu.memory_space<vmem>>, vector<16x32xf32>,
    %c0_i32_8 = arith.constant 0 : i32
    %9 = arith.cmpi eq, %arg2, %c0_i32_8 : i32
    %10 = arith.extui %9 : i1 to i32
    %c0_i32_9 = arith.constant 0 : i32
    %11 = arith.cmpi ne, %10, %c0_i32_9 : i32
    scf.if %11 {
      %c0_10 = arith.constant 0 : index
      %c0_11 = arith.constant 0 : index
      %12 = vector.load %arg7[%c0_10, %c0_11] : memref<16x32xf32, #tpu.memory_space<vmem>>, vector<16x32xf32>
      %c0_12 = arith.constant 0 : index
      %c0_13 = arith.constant 0 : index
      %13 = vector.load %arg5[%c0_12, %c0_13] : memref<1x32xf32, #tpu.memory_space<vmem>>, vector<1x32xf32>
      %14 = vector.broadcast %13 : vector<1x32xf32> to vector<16x32xf32>
      %15 = arith.addf %12, %14 : vector<16x32xf32>
      %c0_14 = arith.constant 0 : index
      %c0_15 = arith.constant 0 : index
      %16 = vector.load %arg6[%c0_14, %c0_15] : memref<16x32xf32, #tpu.memory_space<vmem>>, vector<16x32xf32>
      tpu.vector_store %arg6[%c0_14, %c0_15], %15 {strides = array<i32>} : memref<16x32xf32, #tpu.memory_space<vmem>>, vector<16x32xf32>,
    } else {
    }
    return
  }
  func.func @transform_0(%arg0: i32, %arg1: i32, %arg2: i32) -> (i32, i32) {
    %c0_i32 = arith.constant 0 : i32
    return %arg0, %arg2 : i32, i32
  }
  func.func @transform_1(%arg0: i32, %arg1: i32, %arg2: i32) -> (i32, i32) {
    %c0_i32 = arith.constant 0 : i32
    return %arg2, %arg1 : i32, i32
  }
  func.func @transform_2(%arg0: i32, %arg1: i32, %arg2: i32) -> (i32, i32) {
    %c0_i32 = arith.constant 0 : i32
    %c0_i32_0 = arith.constant 0 : i32
    return %c0_i32, %arg1 : i32, i32
  }
  func.func @transform_3(%arg0: i32, %arg1: i32, %arg2: i32) -> (i32, i32) {
    %c0_i32 = arith.constant 0 : i32
    return %arg0, %arg1 : i32, i32
  }
}

</mosaic_0001>

<bundles_post_ra>
// kernel: mha_forward.5
= control target key start
LH: loop header
LB: loop body
LE: loop exit
PB: predicated region body
PF: predicated region fallthrough
CT: control target
= control target key end

     0   :  { %vm19_vm0 = vcmask 261120   ;;  %v204_v6 = vmov 0.0   ;;  %s269_s0 = inlined_call_operand.vmem [shape: f32[16,32], index: 0, kind: input, shape index: {}]   ;;  %s270_s1 = inlined_call_operand.vmem [shape: f32[32,32], index: 1, kind: input, shape index: {}]   ;;  %s271_s2 = inlined_call_operand.vmem [shape: f32[1,32], index: 2, kind: input, shape index: {}]   ;;  %s272_s3 = inlined_call_operand.hbm [shape: f32[16,32], index: 3, kind: output, shape index: {}]  }
   0x1   :  { %v26_v0 = vld [vmem:[%s270_s1] sm:$0xff]  ;;  %v27_v1 = vld [vmem:[%s270_s1 + $0x8] sm:$0xff]  ;;  %v28_v2 = vld [vmem:[%s270_s1 + $0x10] sm:$0xff]  ;;  %21 = vst.msk [vmem:[#allocation2 + $0x8] sm:$0xff] %vm19_vm0, %v204_v6 }
   0x2   :  { %v168_v3 = vpack.c.bf16 %v27_v1, %v26_v0  ;;  %v29_v4 = vld [vmem:[%s270_s1 + $0x18] sm:$0xff]  ;;  %v24_v5 = vld [vmem:[%s269_s0] sm:$0xff]  ;;  %20 = vst.msk [vmem:[#allocation2] sm:$0xff] %vm19_vm0, %v204_v6 }
   0x3   :  { %v172_v7 = vpack.c.bf16 %v29_v4, %v28_v2  ;;  %165 = vmatprep.mubr.msk.f32.mxu0 %vm19_vm0, %v24_v5 }
   0x4   :  { %8 = vsyncpa [#allocation4], 0  ;;  %169 = vmatprep.subr.bf16.mxu0 %v168_v3  ;;  %v25_v8 = vld [vmem:[%s269_s0 + $0x8] sm:$0xff]  ;;  %v150_v15 = vld [vmem:[%s271_s2] ss:$0 sm:$0xff]  ;;  %s205_s25 = smov [#allocation3]  }
   0x5   :  { %171 = vmatpush3.bf16.msra.mxu0 %v168_v3  ;;  %s137_s26 = sshll.u32 %s205_s25, 4  ;;  %s138_s26 = int_to_ptr.vmem [resolvable:$true] %s137_s26 }
   0x6   :  { %173 = vmatprep.subr.bf16.mxu0 %v172_v7  ;;  %s180_s0 = scalar_lea.vmem %s138_s26, 256  ;;  %p185_p1 = scmp.lt.s32.totalorder %s138_s26, %s138_s26 }
   0x7   :  { %p181_p0 = scmp.ne.s32.totalorder %s138_s26, %s180_s0  ;;  %p186_p2 = scmp.lt.s32.totalorder %s180_s0, %s180_s0 }
   0x8   :  { %v23_v9 = vld [vmem:[#allocation2 + $0x8] sm:$0xff] }
   0x9   :  { %175 = vmatpush3.bf16.msra.mxu0 %v172_v7  ;;  %v22_v10 = vld [vmem:[#allocation2] sm:$0xff]  ;;  %p187_p3 = por %p186_p2, %p185_p1 }
   0xb   :  { %p188_p4 = pnand %p187_p3, %p181_p0 }
   0xc   :  { %166 = vmatmul.mubr.msk.f32.vlgmr.msra.gmra.mrb[0].mxu0 %vm19_vm0, %v25_v8 }
  0xdf   :  { %v167_v11 = vpop.f32.mrb[0].mxu0 }
  0xe0   :  { %v113_v12 = vadd.f32 %v167_v11, %v23_v9  ;;  %v103_v13 = vpop.f32.mrb[1].mxu0 }
  0xe1   :  { %v112_v14 = vadd.f32 %v103_v13, %v22_v10 }
  0xe2   :  { %115 = vst.msk [vmem:[#allocation2 + $0x8] sm:$0xff] %vm19_vm0, %v113_v12 }
  0xe3   :  { %114 = vst.msk [vmem:[#allocation2] sm:$0xff] %vm19_vm0, %v112_v14 }
  0xe9   :  { %v120_v16 = vld [vmem:[#allocation2 + $0x8] sm:$0xff] }
  0xea   :  { %v119_v17 = vld [vmem:[#allocation2] sm:$0xff]  ;;  %v129_v18 = vadd.f32 %v150_v15, %v120_v16 }
  0xeb   :  { %v128_v19 = vadd.f32 %v150_v15, %v119_v17 }
  0xec   :  { %131 = vst.msk [vmem:[#allocation3 + $0x8] sm:$0xff] %vm19_vm0, %v129_v18 }
  0xed   :  { %130 = vst.msk [vmem:[#allocation3] sm:$0xff] %vm19_vm0, %v128_v19 }
  0xee   :  { %191 = shalt.err (!%p188_p4)
}
  0xef   :  { %s192_s28 = scalar_lea.hbm %s272_s3, 256 }
  0xf0   :  { %p193_p5 = scmp.ne.s32.totalorder %s272_s3, %s192_s28  ;;  %p196_p6 = scmp.lt.u32.totalorder %s192_s28, %s272_s3 }
  0xf2   :  { %p198_p7 = pnand %p196_p6, %p193_p5 }
  0xf4   :  { %201 = shalt.err (!%p198_p7)
}
  0xf5   :  { %s206_s6 = smov 128   ;;  %s207_s7 = smov 8  }
  0xf6   :  { %143 = dma.vmem_to_hbm [thread:$0]  %s138_s26, 256, %s272_s3, [#allocation4], %s206_s6, %s206_s6, %s207_s7  }
  0xf7   :  { %202 = dma.done.wait [#allocation4], 256  }
  0xf8   :  { %203 = vsyncadd [#allocation4], 4294967040 }
  0xf9   :  { %147 = vsyncpa [#allocation4], 1 }

// kernel: mha_forward.3
= control target key start
LH: loop header
LB: loop body
LE: loop exit
PB: predicated region body
PF: predicated region fallthrough
CT: control target
= control target key end

     0   :  { %8 = vsyncpa [#allocation4], 0  ;;  %s195_s12 = smov [#allocation3]   ;;  %s252_s0 = inlined_call_operand.hbm [shape: f32[16,16], index: 0, kind: input, shape index: {}]   ;;  %s253_s1 = inlined_call_operand.vmem [shape: f32[16,96], index: 1, kind: input, shape index: {}]   ;;  %s254_s2 = inlined_call_operand.vmem [shape: f32[1,96], index: 2, kind: input, shape index: {}]   ;;  %s255_s3 = inlined_call_operand.vmem [shape: f32[16,96], index: 3, kind: output, shape index: {}]  }
   0x1   :  { %s14_s13 = sshll.u32 %s195_s12, 4  ;;  %s171_s16 = scalar_lea.hbm %s252_s0, 256  ;;  %s15_s13 = int_to_ptr.vmem [resolvable:$true] %s14_s13 }
   0x2   :  { %p172_p0 = scmp.ne.s32.totalorder %s252_s0, %s171_s16  ;;  %p175_p1 = scmp.lt.u32.totalorder %s171_s16, %s252_s0 }
   0x4   :  { %p177_p2 = pnand %p175_p1, %p172_p0 }
   0x6   :  { %180 = shalt.err (!%p177_p2)
}
   0x7   :  { %s181_s21 = scalar_lea.vmem %s15_s13, 256  ;;  %p186_p4 = scmp.lt.s32.totalorder %s15_s13, %s15_s13 }
   0x8   :  { %p182_p3 = scmp.ne.s32.totalorder %s15_s13, %s181_s21  ;;  %p187_p5 = scmp.lt.s32.totalorder %s181_s21, %s181_s21 }
   0xa   :  { %p188_p6 = por %p187_p5, %p186_p4 }
   0xc   :  { %p189_p7 = pnand %p188_p6, %p182_p3 }
   0xe   :  { %192 = shalt.err (!%p189_p7)
}
   0xf   :  { %s196_s22 = smov 128   ;;  %s197_s23 = smov 8  }
  0x10   :  { %20 = dma.hbm_to_vmem [thread:$0]  %s252_s0, 256, %s15_s13, [#allocation4], %s196_s22, %s196_s22, %s197_s23  }
  0x11   :  { %193 = dma.done.wait [#allocation4], 256  }
  0x12   :  { %194 = vsyncadd [#allocation4], 4294967040  ;;  %vm32_vm0 = vcmask 785408   ;;  %v198_v0 = vmov 0.0   ;;  %vm41_vm1 = vcmask 130048   ;;  %v39_v1 = vld [vmem:[%s253_s1] sm:$0xff] }
  0x13   :  { %34 = vst.msk [vmem:[#allocation2 + $0x8] sm:$0xff] %vm32_vm0, %v198_v0  ;;  %33 = vst.msk [vmem:[#allocation2] sm:$0xff] %vm32_vm0, %v198_v0  ;;  %v40_v2 = vld [vmem:[%s253_s1 + $0x8] sm:$0xff]  ;;  %v37_v3 = vld [vmem:[#allocation3] sm:$0xff] }
  0x14   :  { %v163_v4 = vpack.c.bf16 %v40_v2, %v39_v1  ;;  %160 = vmatprep.mubr.msk.f32.mxu0 %vm41_vm1, %v37_v3  ;;  %v38_v5 = vld [vmem:[#allocation3 + $0x8] sm:$0xff]  ;;  %v151_v12 = vld [vmem:[%s254_s2] ss:$0 sm:$0xff] }
  0x16   :  { %164 = vmatprep.subr.bf16.mxu0 %v163_v4 }
  0x17   :  { %166 = vmatpush3.bf16.msra.mxu0 %v163_v4 }
  0x1a   :  { %161 = vmatmul.mubr.msk.f32.vlgmr.msra.gmra.mrb[0].mxu0 %vm41_vm1, %v38_v5  ;;  %v36_v6 = vld [vmem:[#allocation2 + $0x8] sm:$0xff]  ;;  %v35_v7 = vld [vmem:[#allocation2] sm:$0xff] }
  0xed   :  { %v162_v8 = vpop.f32.mrb[0].mxu0 }
  0xee   :  { %v124_v9 = vadd.f32 %v162_v8, %v36_v6  ;;  %v114_v10 = vpop.f32.mrb[1].mxu0 }
  0xef   :  { %v123_v11 = vadd.f32 %v114_v10, %v35_v7 }
  0xf0   :  { %127 = vst.msk [vmem:[#allocation2 + $0x8] sm:$0xff] %vm32_vm0, %v124_v9 }
  0xf1   :  { %126 = vst.msk [vmem:[#allocation2] sm:$0xff] %vm32_vm0, %v123_v11 }
  0xf7   :  { %v132_v13 = vld [vmem:[#allocation2 + $0x8] sm:$0xff] }
  0xf8   :  { %v141_v14 = vadd.f32 %v151_v12, %v132_v13  ;;  %v131_v15 = vld [vmem:[#allocation2] sm:$0xff] }
  0xf9   :  { %v140_v16 = vadd.f32 %v151_v12, %v131_v15 }
  0xfa   :  { %143 = vst.msk [vmem:[%s255_s3 + $0x8] sm:$0xff] %vm32_vm0, %v141_v14 }
  0xfb   :  { %142 = vst.msk [vmem:[%s255_s3] sm:$0xff] %vm32_vm0, %v140_v16 }
  0xfc   :  { %148 = vsyncpa [#allocation4], 1 }

// kernel: mha_forward.4
= control target key start
LH: loop header
LB: loop body
LE: loop exit
PB: predicated region body
PF: predicated region fallthrough
CT: control target
= control target key end

     0   :  { %s1491_s15 = smov 0   ;;  %s1493_s16 = smov 0   ;;  %s1643_s0 = inlined_call_operand.vmem [shape: f32[2,4,8,8], index: 0, kind: input, shape index: {}]   ;;  %s1644_s1 = inlined_call_operand.vmem [shape: f32[2,4,8,8], index: 1, kind: input, shape index: {}]   ;;  %s1645_s2 = inlined_call_operand.vmem [shape: f32[2,4,8,8], index: 2, kind: input, shape index: {}]   ;;  %s1646_s3 = inlined_call_operand.vmem [shape: f32[2,8,8], index: 3, kind: input, shape index: {}]   ;;  %s1647_s4 = inlined_call_operand.vmem [shape: f32[2,8,32], index: 4, kind: output, shape index: {}]  }
   0x1   :  { %s1495_s17 = smov 0  }
   0x2 LB: > { %s33_s18 = sadd.s32 1, %s1453_s16  ;;  %p1296_p0 = scmp.ge.s32.totalorder %s1457_s17, 1  ;;  %s1457_s17 = sphi %s1495_s17, %s14_s17   ;;  %s1453_s16 = sphi %s1493_s16, %s1649_s16   ;;  %s1449_s15 = sphi %s1491_s15, %s1648_s15  }
   0x3   : > { %p35_p1 = scmp.ge.s32.totalorder %s33_s18, 2  ;;  %p237_p2 = scmp.lt.s32.totalorder %s1457_s17, 3 }
   0x5   : > { %s1651_s18 = smov (%p35_p1, %s33_s18), 0  ;;  %p238_p3 = pnand %p1296_p0, %p237_p2 }
   0x6   : > { %p294_p4 = scmp.lt.s32.totalorder (!%p238_p3), %s1449_s15, 1  ;;  %vm348_vm0 = vcmask (!%p238_p3), 64512   ;;  %v1459_v0 = vmov (!%p238_p3), 0.0   ;;  %vm1460_vm1 = vmmov (!%p238_p3), 0   ;;  %vm339_vm2 = vcmask (!%p238_p3), 7168   ;;  %s1463_s7 = smov (!%p238_p3), 8  }
   0x7   : > { %241 = sbr.rel (%p238_p3) target bundleno = 946 (0x3b2), region = 36  ;;  %1338 = vmatprep.subr.mxu0 (!%p238_p3), %v1459_v0  ;;  %349 = vst.msk [vmem:[#allocation4] sm:$0xff] (!%p238_p3), %vm348_vm0, %v1459_v0  ;;  %350 = vst.msk [vmem:[#allocation4 + $0x8] sm:$0xff] (!%p238_p3), %vm348_vm0, %v1459_v0  ;;  %1340 = vmatprep.mubr.msk.f32.mxu0 (!%p238_p3), %vm1460_vm1, %v1459_v0  ;;  %v1461_v13 = vmov (!%p238_p3), -inf   ;;  %v1462_v31 = vmov (!%p238_p3), 0   ;;  %s1464_s8 = smov (!%p238_p3), 16  }
   0x8   : > { %351 = vst.msk [vmem:[#allocation4 + $0x10] sm:$0xff] (!%p238_p3), %vm348_vm0, %v1459_v0  ;;  %352 = vst.msk [vmem:[#allocation4 + $0x18] sm:$0xff] (!%p238_p3), %vm348_vm0, %v1459_v0  ;;  %1343 = vmatprep.subr.mxu1 (!%p238_p3), %v1459_v0  ;;  %1345 = vmatprep.mubr.msk.f32.mxu1 (!%p238_p3), %vm1460_vm1, %v1459_v0  ;;  %s1465_s9 = smov (!%p238_p3), 24   ;;  %vm1152_vm3 = vcmask (!%p238_p3), 130048   ;;  %vm1154_vm4 = vcmask (!%p238_p3), 195584   ;;  %vm1156_vm5 = vcmask (!%p238_p3), 261120  }
   0x9   : > { %340 = vst.msk [vmem:[#allocation2] sm:$0xff] (!%p238_p3), %vm339_vm2, %v1461_v13  ;;  %341 = vst.msk [vmem:[#allocation2 + $0x8] sm:$0xff] (!%p238_p3), %vm339_vm2, %v1461_v13  ;;  %1409 = vset.pattern.permute.xlu0 (!%p238_p3), %v1462_v31  ;;  %1410 = vset.pattern.permute.xlu1 (!%p238_p3), %v1462_v31 }
   0xa   : > { %342 = vst.msk [vmem:[#allocation2 + $0x10] sm:$0xff] (!%p238_p3), %vm339_vm2, %v1461_v13  ;;  %343 = vst.msk [vmem:[#allocation2 + $0x18] sm:$0xff] (!%p238_p3), %vm339_vm2, %v1461_v13 }
   0xb   : > { %344 = vst.msk [vmem:[#allocation3] sm:$0xff] (!%p238_p3), %vm339_vm2, %v1459_v0  ;;  %345 = vst.msk [vmem:[#allocation3 + $0x8] sm:$0xff] (!%p238_p3), %vm339_vm2, %v1459_v0 }
   0xc   : > { %346 = vst.msk [vmem:[#allocation3 + $0x10] sm:$0xff] (!%p238_p3), %vm339_vm2, %v1459_v0  ;;  %347 = vst.msk [vmem:[#allocation3 + $0x18] sm:$0xff] (!%p238_p3), %vm339_vm2, %v1459_v0 }
   0xe   : > { %s1653_s15 = smov (!%p294_p4, %s1449_s15), 1 }
   0xf   : > { %s1526_s19 = sshll.u32 %s1653_s15, 5  ;;  %s1303_s26 = sshll.u32 %s1653_s15, 3 }
  0x10   : > { %s301_s22 = scalar_lea.vmem %s1643_s0, %s1526_s19  ;;  %s309_s25 = scalar_lea.vmem %s1644_s1, %s1526_s19  ;;  %v1578_v32 = vld [vmem:[#allocation2] sm:$0xff]  ;;  %v1583_v35 = vld [vmem:[#allocation2 + $0x8] sm:$0xff] }
  0x11   : > { %v361_v1 = vld [vmem:[%s309_s25] sm:$0xff]  ;;  %v362_v3 = vld [vmem:[%s309_s25 + $0x8] sm:$0xff]  ;;  %v355_v6 = vld [vmem:[%s301_s22 + $0x10] sm:$0xff]  ;;  %s327_s29 = scalar_lea.vmem %s1646_s3, %s1303_s26  ;;  %s317_s6 = scalar_lea.vmem %s1645_s2, %s1526_s19 }
  0x12   : > { %v353_v2 = vld [vmem:[%s301_s22] sm:$0xff]  ;;  %1339 = vmatpush3.xpose.msk.msra.mxu0 %vm348_vm0, %v361_v1  ;;  %1344 = vmatpush3.xpose.msk.msra.mxu1 %vm348_vm0, %v362_v3  ;;  %v354_v5 = vld [vmem:[%s301_s22 + $0x8] sm:$0xff]  ;;  %v363_v8 = vld [vmem:[%s309_s25 + $0x10] sm:$0xff]  ;;  %v359_v11 = vmul.f32 0.35355338, %v355_v6  ;;  %s334_s12 = scalar_lea.vmem %s1647_s4, %s1303_s26 }
  0x13   : > { %v357_v4 = vmul.f32 0.35355338, %v353_v2  ;;  %v358_v7 = vmul.f32 0.35355338, %v354_v5  ;;  %1348 = vmatprep.subr.mxu0 %v1459_v0  ;;  %1353 = vmatprep.subr.mxu1 %v1459_v0  ;;  %v356_v9 = vld [vmem:[%s301_s22 + $0x18] sm:$0xff]  ;;  %v369_v14 = vld [vmem:[%s327_s29] sm:$0xff] }
  0x14   : > { %v364_v10 = vld [vmem:[%s309_s25 + $0x18] sm:$0xff]  ;;  %v360_v12 = vmul.f32 0.35355338, %v356_v9  ;;  %v1585_v36 = vld [vmem:[#allocation2 + $0x10] sm:$0xff]  ;;  %v365_v48 = vld [vmem:[%s317_s6] sm:$0xff] }
  0x15   : > { %1341 = vmatmul.mubr.msk.f32.vlgmr.msra.gmra.mrb[0].mxu0 %vm348_vm0, %v357_v4  ;;  %1346 = vmatmul.mubr.msk.f32.vlgmr.msra.gmra.mrb[0].mxu1 %vm348_vm0, %v358_v7  ;;  %v678_v42 = vld [vmem:[#allocation2 + $0x18] sm:$0xff]  ;;  %v366_v49 = vld [vmem:[%s317_s6 + $0x8] sm:$0xff]  ;;  %v367_v61 = vld [vmem:[%s317_s6 + $0x10] sm:$0xff] }
  0x16   : > { %1349 = vmatpush3.xpose.msk.msra.mxu0 %vm348_vm0, %v363_v8  ;;  %1350 = vmatprep.mubr.msk.f32.mxu0 %vm1460_vm1, %v1459_v0  ;;  %v368_v1 = vld [vmem:[%s317_s6 + $0x18] sm:$0xff] }
  0x17   : > { %1354 = vmatpush3.xpose.msk.msra.mxu1 %vm348_vm0, %v364_v10  ;;  %1355 = vmatprep.mubr.msk.f32.mxu1 %vm1460_vm1, %v1459_v0 }
  0x18   : > { %1358 = vmatprep.subr.mxu0 %v1459_v0  ;;  %1363 = vmatprep.subr.mxu1 %v1459_v0 }
  0x19   : > { %1351 = vmatmul.mubr.msk.f32.vlgmr.msra.gmra.mrb[2].mxu0 %vm348_vm0, %v359_v11 }
  0x1a   : > { %1356 = vmatmul.mubr.msk.f32.vlgmr.msra.gmra.mrb[2].mxu1 %vm348_vm0, %v360_v12  ;;  %1360 = vmatprep.mubr.msk.f32.mxu0 %vm1460_vm1, %v1459_v0 }
  0x1b   : > { %1365 = vmatprep.mubr.msk.f32.mxu1 %vm1460_vm1, %v1459_v0  ;;  %1359 = vmatpush3.msra.mxu0 %v365_v48 }
  0x1c   : > { %1368 = vmatprep.subr.mxu0 %v1459_v0  ;;  %1364 = vmatpush3.msra.mxu1 %v366_v49 }
  0x1d   : > { %1373 = vmatprep.subr.mxu1 %v1459_v0 }
  0xe8   : > { %v443_v15 = vpop.f32.mrb[0].mxu0  ;;  %v519_v16 = vpop.f32.mrb[0].mxu1 }
  0xe9   : > { %v444_v17 = vadd.f32 %v443_v15, %v369_v14  ;;  %v1342_v18 = vpop.f32.mrb[1].mxu0  ;;  %v520_v19 = vadd.f32 %v519_v16, %v369_v14  ;;  %v1347_v20 = vpop.f32.mrb[1].mxu1  ;;  %v740_v15 = vld [vmem:[#allocation3 + $0x8] sm:$0xff] }
  0xea   : > { %v741_v18 = vld [vmem:[#allocation3 + $0x10] sm:$0xff] }
  0xeb   : > { %v679_v21 = vsel %vm348_vm0, %v444_v17, -inf  ;;  %v682_v24 = vsel %vm348_vm0, %v520_v19, -inf }
  0xec   : > { %680 = vmax.xlane.f32.xlu0 %v679_v21  ;;  %v595_v22 = vpop.f32.mrb[2].mxu0 }
  0xed   : > { %v596_v23 = vadd.f32 %v595_v22, %v369_v14  ;;  %v1352_v25 = vpop.f32.mrb[3].mxu0  ;;  %v671_v26 = vpop.f32.mrb[2].mxu1  ;;  %v742_v22 = vld [vmem:[#allocation3 + $0x18] sm:$0xff] }
  0xee   : > { %v672_v27 = vadd.f32 %v671_v26, %v369_v14  ;;  %v1357_v28 = vpop.f32.mrb[3].mxu1 }
  0xef   : > { %v685_v29 = vsel %vm348_vm0, %v596_v23, -inf }
  0xf0   : > { %683 = vmax.xlane.f32.xlu0 %v682_v24  ;;  %686 = vmax.xlane.f32.xlu1 %v685_v29  ;;  %v688_v30 = vsel %vm348_vm0, %v672_v27, -inf }
  0xf4   : > { %689 = vmax.xlane.f32.xlu1 %v688_v30 }
 0x179   : > { %v681_v33 = vpop.xlane.xlu0 %680 }
 0x17a   : > { %v1581_v34 = vmax.f32 %v1578_v32, %v681_v33 }
 0x17c   : > { %v695_v37 = vsub.f32 %v1578_v32, %v1581_v34  ;;  %1096 = vst.msk [vmem:[#allocation2] sm:$0xff] %vm339_vm2, %v1581_v34  ;;  %709 = vperm.xlu0 %1409, %v1581_v34  }
 0x17d   : > { %v684_v38 = vpop.xlane.xlu0 %683  ;;  %v687_v39 = vpop.xlane.xlu1 %686 }
 0x17e   : > { %v692_v40 = vmax.f32 %v1583_v35, %v684_v38  ;;  %v693_v41 = vmax.f32 %v1585_v36, %v687_v39  ;;  %v699_v14 = vmul.f32 1.442695, %v695_v37 }
 0x180   : > { %v696_v43 = vsub.f32 %v1583_v35, %v692_v40  ;;  %1097 = vst.msk [vmem:[#allocation2 + $0x8] sm:$0xff] %vm339_vm2, %v692_v40  ;;  %714 = vperm.xlu1 %1410, %v692_v40   ;;  %v697_v44 = vsub.f32 %v1585_v36, %v693_v41  ;;  %1098 = vst.msk [vmem:[#allocation2 + $0x10] sm:$0xff] %vm339_vm2, %v693_v41  ;;  %v769_v40 = vld [vmem:[#allocation4 + $0x8] sm:$0xff] }
 0x181   : > { %v690_v45 = vpop.xlane.xlu1 %689 }
 0x182   : > { %v694_v46 = vmax.f32 %v678_v42, %v690_v45  ;;  %v703_v8 = vmul.f32 1.442695, %v697_v44  ;;  %v701_v10 = vmul.f32 1.442695, %v696_v43  ;;  %v770_v45 = vld [vmem:[#allocation4 + $0x10] sm:$0xff] }
 0x184   : > { %719 = vperm.xlu1 %1410, %v693_v41   ;;  %v698_v47 = vsub.f32 %v678_v42, %v694_v46  ;;  %1099 = vst.msk [vmem:[#allocation2 + $0x18] sm:$0xff] %vm339_vm2, %v694_v46 }
 0x188   : > { %724 = vperm.xlu1 %1410, %v694_v46  }
 0x1fb   : > { %v710_v50 = vpop.permute.xlu0 %709 }
 0x1fc   : > { %v727_v51 = vsub.f32 %v444_v17, %v710_v50 }
 0x1fe   : > { %v731_v52 = vmul.f32 1.442695, %v727_v51  ;;  %v771_v51 = vld [vmem:[#allocation4 + $0x18] sm:$0xff] }
 0x1ff   : > { %v715_v53 = vpop.permute.xlu1 %714 }
 0x200   : > { %1411 = vpow2.f32 %v731_v52  ;;  %v728_v54 = vsub.f32 %v520_v19, %v715_v53 }
 0x202   : > { %v733_v55 = vmul.f32 1.442695, %v728_v54 }
 0x203   : > { %v720_v56 = vpop.permute.xlu1 %719 }
 0x204   : > { %1413 = vpow2.f32 %v733_v55  ;;  %v729_v57 = vsub.f32 %v596_v23, %v720_v56 }
 0x206   : > { %v735_v58 = vmul.f32 1.442695, %v729_v57 }
 0x207   : > { %v725_v59 = vpop.permute.xlu1 %724 }
 0x208   : > { %1415 = vpow2.f32 %v735_v58  ;;  %v730_v60 = vsub.f32 %v672_v27, %v725_v59  ;;  %v739_v27 = vld [vmem:[#allocation3] sm:$0xff] }
 0x20a   : > { %v1412_v62 = vpop.eup %1411  ;;  %v737_v63 = vmul.f32 1.442695, %v730_v60 }
 0x20b   : > { %1361 = vmatmul.mubr.msk.f32.vlgmr.msra.gmra.mrb[4].mxu0 %vm348_vm0, %v1412_v62  ;;  %v747_v9 = vsel %vm348_vm0, %v1412_v62, 0.0 }
 0x20c   : > { %1417 = vpow2.f32 %v737_v63  ;;  %1369 = vmatpush3.msra.mxu0 %v367_v61  ;;  %1370 = vmatprep.mubr.msk.f32.mxu0 %vm1460_vm1, %v1459_v0 }
 0x20d   : > { %1419 = vpow2.f32 %v703_v8 }
 0x20e   : > { %v1414_v2 = vpop.eup %1413  ;;  %1421 = vpow2.f32 %v701_v10 }
 0x20f   : > { %1366 = vmatmul.mubr.msk.f32.vlgmr.msra.gmra.mrb[4].mxu1 %vm348_vm0, %v1414_v2  ;;  %v750_v3 = vsel %vm348_vm0, %v1414_v2, 0.0 }
 0x210   : > { %751 = vadd.xlane.f32.xlu1 %v750_v3  ;;  %1374 = vmatpush3.msra.mxu1 %v368_v1  ;;  %v768_v3 = vld [vmem:[#allocation4] sm:$0xff] }
 0x211   : > { %1375 = vmatprep.mubr.msk.f32.mxu1 %vm1460_vm1, %v1459_v0  ;;  %v705_v0 = vmul.f32 1.442695, %v698_v47 }
 0x212   : > { %v1416_v4 = vpop.eup %1415 }
 0x213   : > { %1371 = vmatmul.mubr.msk.f32.vlgmr.msra.gmra.mrb[6].mxu0 %vm348_vm0, %v1416_v4  ;;  %v753_v5 = vsel %vm348_vm0, %v1416_v4, 0.0  ;;  %1423 = vpow2.f32 %v705_v0 }
 0x214   : > { %754 = vadd.xlane.f32.xlu0 %v753_v5  ;;  %1425 = vpow2.f32 %v699_v14 }
 0x216   : > { %v1418_v6 = vpop.eup %1417 }
 0x217   : > { %1376 = vmatmul.mubr.msk.f32.vlgmr.msra.gmra.mrb[6].mxu1 %vm348_vm0, %v1418_v6  ;;  %v756_v7 = vsel %vm348_vm0, %v1418_v6, 0.0  ;;  %v1420_v11 = vpop.eup %1419 }
 0x218   : > { %757 = vadd.xlane.f32.xlu1 %v756_v7  ;;  %v1422_v12 = vpop.eup %1421  ;;  %v745_v20 = vmul.f32 %v1420_v11, %v741_v18 }
 0x219   : > { %v744_v16 = vmul.f32 %v1422_v12, %v740_v15 }
 0x21c   : > { %748 = vadd.xlane.f32.xlu1 %v747_v9 }
 0x21d   : > { %v1424_v13 = vpop.eup %1423 }
 0x21e   : > { %v746_v24 = vmul.f32 %v1424_v13, %v742_v22  ;;  %v1426_v25 = vpop.eup %1425 }
 0x21f   : > { %v743_v30 = vmul.f32 %v1426_v25, %v739_v27 }
 0x22a   : > { %784 = vperm.xlu0 %1409, %v1420_v11  }
 0x22d   : > { %779 = vperm.xlu1 %1410, %v1422_v12  }
 0x231   : > { %789 = vperm.xlu1 %1410, %v1424_v13  }
 0x29d   : > { %v752_v17 = vpop.xlane.xlu1 %751 }
 0x29e   : > { %v760_v19 = vadd.f32 %v752_v17, %v744_v16 }
 0x2a0   : > { %765 = vst.msk [vmem:[#allocation3 + $0x8] sm:$0xff] %vm339_vm2, %v760_v19 }
 0x2a1   : > { %v755_v21 = vpop.xlane.xlu0 %754 }
 0x2a2   : > { %v761_v23 = vadd.f32 %v755_v21, %v745_v20 }
 0x2a4   : > { %766 = vst.msk [vmem:[#allocation3 + $0x10] sm:$0xff] %vm339_vm2, %v761_v23 }
 0x2a5   : > { %v758_v26 = vpop.xlane.xlu1 %757 }
 0x2a6   : > { %v762_v28 = vadd.f32 %v758_v26, %v746_v24 }
 0x2a7   : > { %v1108_v29 = vld [vmem:[#allocation3 + $0x8] sm:$0xff] }
 0x2a8   : > { %767 = vst.msk [vmem:[#allocation3 + $0x18] sm:$0xff] %vm339_vm2, %v762_v28  ;;  %1427 = vrcp.f32 %v1108_v29 }
 0x2a9   : > { %v749_v31 = vpop.xlane.xlu1 %748  ;;  %v785_v46 = vpop.permute.xlu0 %784 }
 0x2aa   : > { %v759_v32 = vadd.f32 %v749_v31, %v743_v30  ;;  %v794_v50 = vmul.f32 %v785_v46, %v770_v45 }
 0x2ab   : > { %v1109_v33 = vld [vmem:[#allocation3 + $0x10] sm:$0xff] }
 0x2ac   : > { %764 = vst.msk [vmem:[#allocation3] sm:$0xff] %vm339_vm2, %v759_v32  ;;  %1429 = vrcp.f32 %v1109_v33 }
 0x2ad   : > { %v780_v41 = vpop.permute.xlu1 %779 }
 0x2ae   : > { %v793_v44 = vmul.f32 %v780_v41, %v769_v40 }
 0x2af   : > { %v1110_v34 = vld [vmem:[#allocation3 + $0x18] sm:$0xff] }
 0x2b0   : > { %1431 = vrcp.f32 %v1110_v34 }
 0x2b1   : > { %v790_v52 = vpop.permute.xlu1 %789 }
 0x2b2   : > { %v1428_v35 = vpop.eup %1427  ;;  %v795_v56 = vmul.f32 %v790_v52, %v771_v51 }
 0x2b3   : > { %1122 = vperm.xlu1 %1410, %v1428_v35   ;;  %v1107_v36 = vld [vmem:[#allocation3] sm:$0xff] }
 0x2b4   : > { %1433 = vrcp.f32 %v1107_v36 }
 0x2b6   : > { %v1430_v37 = vpop.eup %1429 }
 0x2b7   : > { %1127 = vperm.xlu1 %1410, %v1430_v37  }
 0x2ba   : > { %v1432_v38 = vpop.eup %1431 }
 0x2bb   : > { %774 = vperm.xlu1 %1410, %v1426_v25   ;;  %1132 = vperm.xlu0 %1409, %v1432_v38  }
 0x2be   : > { %v1434_v39 = vpop.eup %1433 }
 0x2bf   : > { %1117 = vperm.xlu0 %1409, %v1434_v39  }
 0x2de   : > { %v865_v42 = vpop.f32.mrb[4].mxu0 }
 0x2df   : > { %v1362_v43 = vpop.f32.mrb[5].mxu0 }
 0x2e2   : > { %v938_v47 = vpop.f32.mrb[4].mxu1 }
 0x2e3   : > { %v1089_v48 = vadd.f32 %v938_v47, %v793_v44  ;;  %v1367_v49 = vpop.f32.mrb[5].mxu1 }
 0x2e5   : > { %1093 = vst.msk [vmem:[#allocation4 + $0x8] sm:$0xff] %vm348_vm0, %v1089_v48 }
 0x2e6   : > { %v1011_v53 = vpop.f32.mrb[6].mxu0 }
 0x2e7   : > { %v1090_v54 = vadd.f32 %v1011_v53, %v794_v50  ;;  %v1372_v55 = vpop.f32.mrb[7].mxu0 }
 0x2e9   : > { %1094 = vst.msk [vmem:[#allocation4 + $0x10] sm:$0xff] %vm348_vm0, %v1090_v54 }
 0x2ea   : > { %v1084_v57 = vpop.f32.mrb[6].mxu1 }
 0x2eb   : > { %v1091_v58 = vadd.f32 %v1084_v57, %v795_v56  ;;  %v1377_v59 = vpop.f32.mrb[7].mxu1 }
 0x2ec   : > { %v1104_v60 = vld [vmem:[#allocation4 + $0x8] sm:$0xff] }
 0x2ed   : > { %1095 = vst.msk [vmem:[#allocation4 + $0x18] sm:$0xff] %vm348_vm0, %v1091_v58 }
 0x2f0   : > { %v1105_v1 = vld [vmem:[#allocation4 + $0x10] sm:$0xff] }
 0x2f4   : > { %v1106_v5 = vld [vmem:[#allocation4 + $0x18] sm:$0xff] }
 0x332   : > { %v1123_v61 = vpop.permute.xlu1 %1122 }
 0x333   : > { %v1136_v62 = vmul.f32 %v1123_v61, %v1104_v60 }
 0x335   : > { %1140 = vrot.lane.b32.xlu1 %v1136_v62, %s1463_s7 }
 0x336   : > { %v1128_v63 = vpop.permute.xlu1 %1127 }
 0x337   : > { %v1137_v2 = vmul.f32 %v1128_v63, %v1105_v1 }
 0x339   : > { %1144 = vrot.lane.b32.xlu0 %v1137_v2, %s1464_s8 }
 0x33a   : > { %v1133_v4 = vpop.permute.xlu0 %1132  ;;  %v775_v6 = vpop.permute.xlu1 %774 }
 0x33b   : > { %v1138_v7 = vmul.f32 %v1133_v4, %v1106_v5  ;;  %v792_v8 = vmul.f32 %v775_v6, %v768_v3 }
 0x33d   : > { %v1088_v9 = vadd.f32 %v865_v42, %v792_v8  ;;  %1148 = vrot.lane.b32.xlu1 %v1138_v7, %s1465_s9 }
 0x33e   : > { %v1118_v10 = vpop.permute.xlu0 %1117 }
 0x33f   : > { %1092 = vst.msk [vmem:[#allocation4] sm:$0xff] %vm348_vm0, %v1088_v9 }
 0x346   : > { %v1103_v0 = vld [vmem:[#allocation4] sm:$0xff] }
 0x347   : > { %v1135_v12 = vmul.f32 %v1118_v10, %v1103_v0 }
 0x3a7   : > { %v1141_v11 = vpop.permute.xlu1 %1140 }
 0x3a8   : > { %v1151_v14 = vsel %vm348_vm0, %v1135_v12, %v1141_v11 }
 0x3ab   : > { %v1145_v13 = vpop.permute.xlu0 %1144 }
 0x3ac   : > { %v1153_v15 = vsel %vm1152_vm3, %v1151_v14, %v1145_v13 }
 0x3af   : > { %v1149_v16 = vpop.permute.xlu1 %1148 }
 0x3b0   : > { %v1155_v17 = vsel %vm1154_vm4, %v1153_v15, %v1149_v16 }
 0x3b1   : > { %1157 = vst.msk [vmem:[%s334_s12] sm:$0xff] %vm1156_vm5, %v1155_v17 }
 0x3b2 PF: > { %s14_s17 = sadd.s32 1, %s1457_s17   ;;  %s1648_s15 = smov %s1453_s16 }
 0x3b3   : > { %p11_p5 = scmp.ge.s32.totalorder %s14_s17, 4   ;;  %s1649_s16 = smov %s1651_s18 }
 0x3b5   :  { %13 = sbr.rel (!%p11_p5) target bundleno = 2 (0x2), region = 83 }

</bundles_post_ra>
